<compile_context>
chip_gen: v7x
topology: tpu7x:2x2x1
jax: 0.10.0
libtpu: 0.0.40
codegen_flags: <defaults>
</compile_context>

<pallas_src>
import numpy as np
import jax
import jax.numpy as jnp
from jax import lax
from jax.experimental import pallas as pl
from jax.experimental.pallas import tpu as pltpu


def create_dct_matrix(N: int) -> np.ndarray:
    """Same construction as the PyTorch module (type-II DCT matrix)."""
    dct = np.zeros((N, N), dtype=np.float64)
    for k in range(N):
        for n in range(N):
            if k == 0:
                dct[k, n] = np.sqrt(1.0 / N)
            else:
                dct[k, n] = np.sqrt(2.0 / N) * np.cos(
                    np.pi * k * (2 * n + 1) / (2 * N)
                )
    return dct.astype(np.float32)


_KRON_MAX_N = 16                # Kronecker path only while N^2 <= 256
_BLOCK_BYTES_TARGET = 8 << 20   # ~8 MiB per x / out block (double-buffered)
_VMEM_LIMIT_FLOOR = 16 << 20    # never request less than v5e's default
_VMEM_LIMIT_CAP = 48 << 20      # stay well under v7x's 64 MiB physical VMEM
_PRECISION = jax.lax.Precision.HIGHEST


def prepare_idct_operator(idct_matrix: jax.Array) -> jax.Array:
    """Precompute the resident operator once (call at init, outside jit).

    Returns K = (M ⊗ M)^T of shape (N^2, N^2) for N <= 16, else M of shape (N, N).
    """
    N = idct_matrix.shape[0]
    m = jnp.asarray(idct_matrix, jnp.float32)
    if N <= _KRON_MAX_N:
        return jnp.kron(m, m).T
    return m


# ------------------------- kernels -------------------------


def _idct_kron_kernel(k_ref, x_ref, o_ref):
    # x_ref: (T, N*N) row-major flattened slices; k_ref: (N*N, N*N) resident K.
    # One lane-dense MXU matmul per grid step.
    o_ref[...] = lax.dot_general(
        x_ref[...], k_ref[...],
        dimension_numbers=(((1,), (0,)), ((), ())),
        preferred_element_type=jnp.float32,
        precision=_PRECISION,
    )


def _idct_sep_kernel(m_ref, x_ref, o_ref):
    # x_ref / o_ref: (T, N, N); m_ref: (N, N) resident M.
    # Per slice:  Z = X @ M^T  (contract lanes of x with lanes of m, i.e. the
    # transpose is folded into the contraction dims — no separate M^T input),
    # then  out = M @ Z  (canonical matmul).  Only one (N, N) intermediate is
    # live at a time, bounding VMEM independently of the block size T.
    T = x_ref.shape[0]
    m = m_ref[...]

    def one_slice(b):
        z = lax.dot_general(
            x_ref[b], m,
            dimension_numbers=(((1,), (1,)), ((), ())),
            preferred_element_type=jnp.float32,
            precision=_PRECISION,
        )
        o_ref[b] = lax.dot_general(
            m, z,
            dimension_numbers=(((1,), (0,)), ((), ())),
            preferred_element_type=jnp.float32,
            precision=_PRECISION,
        )

    if T <= 32:
        for b in range(T):            # static unroll: scheduler sees everything
            one_slice(b)
    else:
        @pl.loop(0, T)
        def _(b):
            one_slice(b)


# ------------------------- wrapper -------------------------


def _round_up(x: int, m: int) -> int:
    return ((x + m - 1) // m) * m


def _vmem_limit(need_bytes: int) -> int:
    return int(min(_VMEM_LIMIT_CAP, max(_VMEM_LIMIT_FLOOR, need_bytes)))


def idct_layer(x: jax.Array, op: jax.Array) -> jax.Array:
    """x: (B, C, N, N) float32; op = prepare_idct_operator(idct_matrix)."""
    B, C, H, W = x.shape
    N = H
    assert H == W, "IDCTLayer requires H == W == N"
    BC = B * C

    if op.shape == (N * N, N * N) and N <= _KRON_MAX_N:
        # ---- small-N path: one Kronecker matmul over a large batch of rows ----
        # out[b,c] = M @ X @ M^T  <=>  flat_row(out) = flat_row(X) @ (M ⊗ M)^T
        row_bytes = N * N * 4
        t_cap = max(8, ((_BLOCK_BYTES_TARGET // row_bytes) // 8) * 8)
        if BC <= t_cap:
            T = BC                                  # full extent: no sublane constraint
            if BC >= 16:                            # enough work: >= 2 steps (v7x megacore)
                T = _round_up(pl.cdiv(BC, 2), 8)
        else:
            steps = pl.cdiv(BC, t_cap)
            T = min(t_cap, _round_up(pl.cdiv(BC, steps), 8))
        grid = (pl.cdiv(BC, T),)

        x_flat = x.reshape(BC, N * N)
        k_bytes = (N * N) * (N * N) * 4
        need = 2 * k_bytes + 4 * T * row_bytes + (4 << 20)

        out_flat = pl.pallas_call(
            _idct_kron_kernel,
            out_shape=jax.ShapeDtypeStruct((BC, N * N), jnp.float32),
            grid_spec=pltpu.PrefetchScalarGridSpec(
                num_scalar_prefetch=0,
                grid=grid,
                in_specs=[
                    pl.BlockSpec((N * N, N * N), lambda i: (0, 0)),  # K resident
                    pl.BlockSpec((T, N * N), lambda i: (i, 0)),      # batched rows
                ],
                out_specs=pl.BlockSpec((T, N * N), lambda i: (i, 0)),
            ),
            compiler_params=pltpu.CompilerParams(
                dimension_semantics=("parallel",),
                vmem_limit_bytes=_vmem_limit(need),
            ),
        )(op, x_flat)
        return out_flat.reshape(B, C, H, W)

    # ---- large-N path (e.g. IMAGE_SIZE = 224): separable, per-slice ----
    assert op.shape == (N, N), "operator must be M for the separable path"
    slice_bytes = N * N * 4
    T = max(1, min(BC, _BLOCK_BYTES_TARGET // slice_bytes))
    if T == BC and BC >= 4:                          # keep >= 2 steps (v7x megacore)
        T = pl.cdiv(BC, 2)
    steps = pl.cdiv(BC, T)
    T = pl.cdiv(BC, steps)                           # balance blocks across steps
    grid = (pl.cdiv(BC, T),)

    x_slices = x.reshape(BC, N, N)
    need = 2 * (N * N * 4) + 4 * T * slice_bytes + 2 * slice_bytes + (4 << 20)

    out_slices = pl.pallas_call(
        _idct_sep_kernel,
        out_shape=jax.ShapeDtypeStruct((BC, N, N), jnp.float32),
        grid_spec=pltpu.PrefetchScalarGridSpec(
            num_scalar_prefetch=0,
            grid=grid,
            in_specs=[
                pl.BlockSpec((N, N), lambda i: (0, 0)),          # M resident
                pl.BlockSpec((T, N, N), lambda i: (i, 0, 0)),    # T slices / step
            ],
            out_specs=pl.BlockSpec((T, N, N), lambda i: (i, 0, 0)),
        ),
        compiler_params=pltpu.CompilerParams(
            dimension_semantics=("parallel",),
            vmem_limit_bytes=_vmem_limit(need),
        ),
    )(op, x_slices)
    return out_slices.reshape(B, C, H, W)


if __name__ == "__main__":
    # Small, module-consistent shapes: spatial size N plays the role of
    # IMAGE_SIZE = 224 (scaled down to 16 for the test).
    B, C, N = 2, 4, 16

    # Deterministic "parameter" (buffer): idct_matrix = DCT(N).T
    idct_matrix = jnp.asarray(create_dct_matrix(N).T)
    op = prepare_idct_operator(idct_matrix)          # hoisted out of the forward

    key = jax.random.PRNGKey(0)
    x = jax.random.normal(key, (B, C, N, N), dtype=jnp.float32)

    fn = jax.jit(idct_layer)
    out = jax.block_until_ready(fn(x, op))

    # Host float64 reference of the exact module math: M @ X @ M^T per slice.
    m64 = np.asarray(idct_matrix, dtype=np.float64)
    x64 = np.asarray(x, dtype=np.float64)
    ref = np.einsum("ij,bcjk,lk->bcil", m64, x64, m64)
    np.testing.assert_allclose(np.asarray(out), ref, rtol=1e-4, atol=1e-4)

    print("KERNEL_OK")
</pallas_src>

<mosaic_0001>
module attributes {stable_mosaic.version = 11 : i64} {
  func.func @_idct_kron_kernel(%arg0: i32, %arg1: memref<256x256xf32, #tpu.memory_space<vmem>>, %arg2: memref<8x256xf32, #tpu.memory_space<vmem>>, %arg3: memref<8x256xf32, #tpu.memory_space<vmem>>) attributes {dimension_semantics = [#tpu.dimension_semantics<parallel>], iteration_bounds = array<i64: 1>, scalar_prefetch = 0 : i64, scratch_operands = 0 : i64, tpu.core_type = #tpu.core_type<tc>, window_params = [{pipeline_mode = #tpu.pipeline_mode<synchronous>, transform_indices = @transform_0, window_bounds = array<i64: 256, 256>}, {transform_indices = @transform_1, window_bounds = array<i64: 8, 256>}, {transform_indices = @transform_2, window_bounds = array<i64: 8, 256>}]} {
    %c0 = arith.constant 0 : index
    %c0_0 = arith.constant 0 : index
    %0 = vector.load %arg2[%c0, %c0_0] : memref<8x256xf32, #tpu.memory_space<vmem>>, vector<8x256xf32>
    %c0_1 = arith.constant 0 : index
    %c0_2 = arith.constant 0 : index
    %1 = vector.load %arg1[%c0_1, %c0_2] : memref<256x256xf32, #tpu.memory_space<vmem>>, vector<256x256xf32>
    %cst = arith.constant dense<0.000000e+00> : vector<8x256xf32>
    %2 = tpu.matmul %0, %1, %cst {dimension_numbers = #tpu.dot_dimension_numbers<[1], [0], [0], [1], [0, 0, 1, 1], [], []>, precision = #tpu.contract_precision<fp32>} : vector<8x256xf32>, vector<256x256xf32>, vector<8x256xf32> -> vector<8x256xf32>
    %c0_3 = arith.constant 0 : index
    %c0_4 = arith.constant 0 : index
    %3 = vector.load %arg3[%c0_3, %c0_4] : memref<8x256xf32, #tpu.memory_space<vmem>>, vector<8x256xf32>
    tpu.vector_store %arg3[%c0_3, %c0_4], %2 {strides = array<i32>} : memref<8x256xf32, #tpu.memory_space<vmem>>, vector<8x256xf32>,
    return
  }
  func.func @transform_0(%arg0: i32) -> (i32, i32) {
    %c0_i32 = arith.constant 0 : i32
    %c0_i32_0 = arith.constant 0 : i32
    %c0_i32_1 = arith.constant 0 : i32
    return %c0_i32, %c0_i32_0 : i32, i32
  }
  func.func @transform_1(%arg0: i32) -> (i32, i32) {
    %c0_i32 = arith.constant 0 : i32
    %c0_i32_0 = arith.constant 0 : i32
    return %arg0, %c0_i32 : i32, i32
  }
  func.func @transform_2(%arg0: i32) -> (i32, i32) {
    %c0_i32 = arith.constant 0 : i32
    %c0_i32_0 = arith.constant 0 : i32
    return %arg0, %c0_i32 : i32, i32
  }
}

</mosaic_0001>

<bundles_post_ra>
// kernel: idct_layer.1
= control target key start
LH: loop header
LB: loop body
LE: loop exit
PB: predicated region body
PF: predicated region fallthrough
CT: control target
= control target key end

     0   :  { %7 = vsyncpa [#allocation3], 0  ;;  %s1803_s9 = smov [#allocation2]   ;;  %s2596_s0 = inlined_call_operand.hbm [shape: f32[256,256], index: 0, kind: input, shape index: {}]   ;;  %s2597_s1 = inlined_call_operand.vmem [shape: f32[8,256], index: 1, kind: input, shape index: {}]   ;;  %s2598_s2 = inlined_call_operand.vmem [shape: f32[8,256], index: 2, kind: output, shape index: {}]  }
   0x1   :  { %s13_s10 = sshll.u32 %s1803_s9, 4  ;;  %s1779_s13 = scalar_lea.hbm %s2596_s0, 8192  ;;  %s14_s10 = int_to_ptr.vmem [resolvable:$true] %s13_s10 }
   0x2   :  { %p1780_p0 = scmp.ne.s32.totalorder %s2596_s0, %s1779_s13  ;;  %p1783_p1 = scmp.lt.u32.totalorder %s1779_s13, %s2596_s0 }
   0x4   :  { %p1785_p2 = pnand %p1783_p1, %p1780_p0 }
   0x6   :  { %1788 = shalt.err (!%p1785_p2)
}
   0x7   :  { %s1789_s18 = scalar_lea.vmem %s14_s10, 8192  ;;  %p1794_p4 = scmp.lt.s32.totalorder %s14_s10, %s14_s10 }
   0x8   :  { %p1790_p3 = scmp.ne.s32.totalorder %s14_s10, %s1789_s18  ;;  %p1795_p5 = scmp.lt.s32.totalorder %s1789_s18, %s1789_s18 }
   0xa   :  { %p1796_p6 = por %p1795_p5, %p1794_p4 }
   0xc   :  { %p1797_p7 = pnand %p1796_p6, %p1790_p3 }
   0xe   :  { %1800 = shalt.err (!%p1797_p7)
}
   0xf   :  { %s1804_s19 = smov 256   ;;  %s1805_s20 = smov 16  }
  0x10   :  { %19 = dma.hbm_to_vmem [thread:$0]  %s2596_s0, 8192, %s14_s10, [#allocation3], %s1804_s19, %s1804_s19, %s1805_s20  }
  0x11   :  { %1801 = dma.done.wait [#allocation3], 8192  }
  0x12   :  { %1802 = vsyncadd [#allocation3], 4294959104  ;;  %v28_v0 = vld [vmem:[#allocation2 + $0x8] sm:$0xff]  ;;  %v30_v1 = vld [vmem:[#allocation2 + $0x18] sm:$0xff] }
  0x13   :  { %v27_v2 = vld [vmem:[#allocation2] sm:$0xff]  ;;  %v91_v3 = vand.u32 4294901760, %v28_v0  ;;  %v95_v4 = vand.u32 4294901760, %v30_v1  ;;  %v29_v5 = vld [vmem:[#allocation2 + $0x10] sm:$0xff]  ;;  %v32_v7 = vld [vmem:[#allocation2 + $0x28] sm:$0xff] }
  0x14   :  { %v93_v6 = vand.u32 4294901760, %v27_v2  ;;  %v34_v8 = vld [vmem:[#allocation2 + $0x38] sm:$0xff]  ;;  %v97_v9 = vand.u32 4294901760, %v29_v5  ;;  %v99_v10 = vand.u32 4294901760, %v32_v7  ;;  %v31_v12 = vld [vmem:[#allocation2 + $0x20] sm:$0xff]  ;;  %v33_v13 = vld [vmem:[#allocation2 + $0x30] sm:$0xff] }
  0x15   :  { %v103_v11 = vand.u32 4294901760, %v34_v8  ;;  %v36_v14 = vld [vmem:[#allocation2 + $0x48] sm:$0xff]  ;;  %v1833_v15 = vpack.c.bf16 %v95_v4, %v91_v3  ;;  %v1835_v16 = vld [vmem:[#allocation2 + $0x58] sm:$0xff]  ;;  %v1837_v17 = vld [vmem:[#allocation2 + $0x40] sm:$0xff]  ;;  %v101_v23 = vand.u32 4294901760, %v31_v12  ;;  %v105_v24 = vand.u32 4294901760, %v33_v13 }
  0x16   :  { %v1839_v18 = vld [vmem:[#allocation2 + $0x50] sm:$0xff]  ;;  %v1841_v19 = vpack.c.bf16 %v97_v9, %v93_v6  ;;  %v40_v21 = vld [vmem:[#allocation2 + $0x68] sm:$0xff]  ;;  %v42_v22 = vld [vmem:[#allocation2 + $0x78] sm:$0xff]  ;;  %v107_v25 = vand.u32 4294901760, %v36_v14  ;;  %v111_v26 = vand.u32 4294901760, %v1835_v16  ;;  %v109_v27 = vand.u32 4294901760, %v1837_v17 }
  0x17   :  { %2746 = vst [vmem:[#allocation5_spill] sm:$0xff] %v1833_v15  ;;  %v1843_v20 = vpack.c.bf16 %v103_v11, %v99_v10  ;;  %1383 = vmatprep.subr.bf16.mxu1 %v1833_v15  ;;  %1575 = vmatprep.subr.bf16.mxu0 %v1833_v15  ;;  %v113_v28 = vand.u32 4294901760, %v1839_v18  ;;  %v1854_v29 = vpack.c.bf16 %v105_v24, %v101_v23  ;;  %v115_v30 = vand.u32 4294901760, %v40_v21  ;;  %v39_v32 = vld [vmem:[#allocation2 + $0x60] sm:$0xff]  ;;  %v41_v33 = vld [vmem:[#allocation2 + $0x70] sm:$0xff]  ;;  %v44_v35 = vld [vmem:[#allocation2 + $0x88] sm:$0xff] }
  0x18   :  { %2747 = vst [vmem:[#allocation6_spill] sm:$0xff] %v1841_v19  ;;  %1385 = vmatpush1.bf16.msra.mxu1 %v1841_v19  ;;  %1577 = vmatpush1.bf16.msra.mxu0 %v1841_v19  ;;  %v119_v31 = vand.u32 4294901760, %v42_v22  ;;  %v1856_v34 = vpack.c.bf16 %v111_v26, %v107_v25  ;;  %v46_v36 = vld [vmem:[#allocation2 + $0x98] sm:$0xff]  ;;  %v117_v38 = vand.u32 4294901760, %v39_v32  ;;  %v121_v39 = vand.u32 4294901760, %v41_v33  ;;  %v43_v43 = vld [vmem:[#allocation2 + $0x80] sm:$0xff] }
  0x19   :  { %2748 = vst [vmem:[#allocation7_spill] sm:$0xff] %v1843_v20  ;;  %1387 = vmatprep.subr.bf16.mxu1 %v1843_v20  ;;  %1579 = vmatprep.subr.bf16.mxu0 %v1843_v20  ;;  %2749 = vst [vmem:[#allocation8_spill] sm:$0xff] %v1854_v29  ;;  %v1860_v37 = vpack.c.bf16 %v113_v28, %v109_v27  ;;  %v123_v41 = vand.u32 4294901760, %v44_v35  ;;  %v127_v42 = vand.u32 4294901760, %v46_v36  ;;  %v45_v44 = vld [vmem:[#allocation2 + $0x90] sm:$0xff]  ;;  %v48_v48 = vld [vmem:[#allocation2 + $0xa8] sm:$0xff] }
  0x1a   :  { %2750 = vst [vmem:[#allocation9_spill] sm:$0xff] %v1856_v34  ;;  %v1864_v40 = vpack.c.bf16 %v119_v31, %v115_v30  ;;  %v1866_v45 = vsub.f32 %v28_v0, %v91_v3  ;;  %v1868_v46 = vsub.f32 %v30_v1, %v95_v4  ;;  %v1870_v47 = vsub.f32 %v27_v2, %v93_v6  ;;  %v50_v49 = vld [vmem:[#allocation2 + $0xb8] sm:$0xff]  ;;  %v47_v58 = vld [vmem:[#allocation2 + $0xa0] sm:$0xff]  ;;  %v49_v59 = vld [vmem:[#allocation2 + $0xb0] sm:$0xff] }
  0x1b   :  { %2751 = vst [vmem:[#allocation10_spill] sm:$0xff] %v1860_v37  ;;  %v1872_v50 = vsub.f32 %v29_v5, %v97_v9  ;;  %v1874_v51 = vsub.f32 %v32_v7, %v99_v10  ;;  %v1876_v52 = vsub.f32 %v34_v8, %v103_v11  ;;  %v1878_v53 = vsub.f32 %v31_v12, %v101_v23  ;;  %v52_v0 = vld [vmem:[#allocation2 + $0xc8] sm:$0xff]  ;;  %v54_v1 = vld [vmem:[#allocation2 + $0xd8] sm:$0xff]  ;;  %v51_v10 = vld [vmem:[#allocation2 + $0xc0] sm:$0xff] }
  0x1c   :  { %1389 = vmatpush1.bf16.msra.mxu1 %v1854_v29  ;;  %1581 = vmatpush1.bf16.msra.mxu0 %v1854_v29  ;;  %2752 = vst [vmem:[#allocation11_spill] sm:$0xff] %v1864_v40  ;;  %2753 = vst [vmem:[#allocation12_spill] sm:$0xff] %v1866_v45  ;;  %v1880_v54 = vsub.f32 %v33_v13, %v105_v24  ;;  %v1884_v55 = vpack.c.bf16 %v121_v39, %v117_v38  ;;  %v125_v56 = vand.u32 4294901760, %v43_v43  ;;  %v53_v11 = vld [vmem:[#allocation2 + $0xd0] sm:$0xff]  ;;  %v58_v23 = vld [vmem:[#allocation2 + $0xf8] sm:$0xff] }
  0x1d   :  { %1391 = vmatprep.subr.bf16.mxu1 %v1856_v34  ;;  %1583 = vmatprep.subr.bf16.mxu0 %v1856_v34  ;;  %2754 = vst [vmem:[#allocation13_spill] sm:$0xff] %v1868_v46  ;;  %2755 = vst [vmem:[#allocation14_spill] sm:$0xff] %v1870_v47  ;;  %v129_v57 = vand.u32 4294901760, %v45_v44  ;;  %v1886_v60 = vsub.f32 %v36_v14, %v107_v25  ;;  %v1890_v61 = vpack.c.bf16 %v127_v42, %v123_v41  ;;  %v70_v34 = vld [vmem:[#allocation2 + $0x158] sm:$0xff]  ;;  %v67_v20 = vld [vmem:[#allocation2 + $0x140] sm:$0xff] }
  0x1e   :  { %2756 = vst [vmem:[#allocation15_spill] sm:$0xff] %v1872_v50  ;;  %2757 = vst [vmem:[#allocation16_spill] sm:$0xff] %v1874_v51  ;;  %v131_v62 = vand.u32 4294901760, %v48_v48  ;;  %v135_v63 = vand.u32 4294901760, %v50_v49  ;;  %v1893_v2 = vsub.f32 %v1835_v16, %v111_v26  ;;  %v1896_v3 = vsub.f32 %v1837_v17, %v109_v27 }
  0x1f   :  { %2758 = vst [vmem:[#allocation17_spill] sm:$0xff] %v1876_v52  ;;  %2759 = vst [vmem:[#allocation18_spill] sm:$0xff] %v1884_v55  ;;  %v1899_v4 = vsub.f32 %v1839_v18, %v113_v28  ;;  %v1901_v5 = vsub.f32 %v40_v21, %v115_v30  ;;  %v1903_v6 = vsub.f32 %v42_v22, %v119_v31  ;;  %v133_v8 = vand.u32 4294901760, %v47_v58  ;;  %v56_v22 = vld [vmem:[#allocation2 + $0xe8] sm:$0xff]  ;;  %v55_v28 = vld [vmem:[#allocation2 + $0xe0] sm:$0xff] }
  0x20   :  { %1393 = vmatpush1.bf16.msra.mxu1 %v1860_v37  ;;  %1585 = vmatpush1.bf16.msra.mxu0 %v1860_v37  ;;  %2760 = vst [vmem:[#allocation19_spill] sm:$0xff] %v1890_v61  ;;  %2761 = vst [vmem:[#allocation20_spill] sm:$0xff] %v1896_v3  ;;  %v1905_v7 = vsub.f32 %v39_v32, %v117_v38  ;;  %v137_v9 = vand.u32 4294901760, %v49_v59  ;;  %v1908_v12 = vsub.f32 %v41_v33, %v121_v39  ;;  %v57_v30 = vld [vmem:[#allocation2 + $0xf0] sm:$0xff]  ;;  %v62_v38 = vld [vmem:[#allocation2 + $0x118] sm:$0xff] }
  0x21   :  { %1395 = vmatprep.subr.bf16.mxu1 %v1864_v40  ;;  %1587 = vmatprep.subr.bf16.mxu0 %v1864_v40  ;;  %2762 = vst [vmem:[#allocation21_spill] sm:$0xff] %v1899_v4  ;;  %2763 = vst [vmem:[#allocation22_spill] sm:$0xff] %v1901_v5  ;;  %v1911_v13 = vpack.c.bf16 %v129_v57, %v125_v56  ;;  %v139_v14 = vand.u32 4294901760, %v52_v0  ;;  %v143_v16 = vand.u32 4294901760, %v54_v1  ;;  %v141_v26 = vand.u32 4294901760, %v51_v10 }
  0x22   :  { %2764 = vst [vmem:[#allocation23_spill] sm:$0xff] %v1905_v7  ;;  %2765 = vst [vmem:[#allocation24_spill] sm:$0xff] %v1908_v12  ;;  %v1914_v17 = vsub.f32 %v44_v35, %v123_v41  ;;  %v1916_v18 = vsub.f32 %v46_v36, %v127_v42  ;;  %v1919_v21 = vpack.c.bf16 %v135_v63, %v131_v62  ;;  %v145_v27 = vand.u32 4294901760, %v53_v11  ;;  %v60_v36 = vld [vmem:[#allocation2 + $0x108] sm:$0xff] }
  0x23   :  { %2766 = vst [vmem:[#allocation25_spill] sm:$0xff] %v1911_v13  ;;  %v1921_v24 = vsub.f32 %v43_v43, %v125_v56  ;;  %v1923_v25 = vsub.f32 %v45_v44, %v129_v57  ;;  %v1925_v31 = vsub.f32 %v48_v48, %v131_v62  ;;  %v1927_v32 = vsub.f32 %v50_v49, %v135_v63  ;;  %v59_v44 = vld [vmem:[#allocation2 + $0x100] sm:$0xff]  ;;  %v61_v48 = vld [vmem:[#allocation2 + $0x110] sm:$0xff]  ;;  %v64_v62 = vld [vmem:[#allocation2 + $0x128] sm:$0xff] }
  0x24   :  { %1397 = vmatpush1.bf16.msra.mxu1 %v1884_v55  ;;  %1589 = vmatpush1.bf16.msra.mxu0 %v1884_v55  ;;  %2767 = vst [vmem:[#allocation26_spill] sm:$0xff] %v1914_v17  ;;  %2768 = vst [vmem:[#allocation27_spill] sm:$0xff] %v1916_v18  ;;  %v1929_v33 = vpack.c.bf16 %v137_v9, %v133_v8  ;;  %v1931_v35 = vsub.f32 %v47_v58, %v133_v8  ;;  %v147_v42 = vand.u32 4294901760, %v56_v22  ;;  %v66_v63 = vld [vmem:[#allocation2 + $0x138] sm:$0xff]  ;;  %v65_v55 = vld [vmem:[#allocation2 + $0x130] sm:$0xff] }
  0x25   :  { %1399 = vmatprep.subr.bf16.mxu1 %v1890_v61  ;;  %1591 = vmatprep.subr.bf16.mxu0 %v1890_v61  ;;  %2769 = vst [vmem:[#allocation28_spill] sm:$0xff] %v1919_v21  ;;  %2770 = vst [vmem:[#allocation29_spill] sm:$0xff] %v1921_v24  ;;  %v1935_v39 = vsub.f32 %v49_v59, %v137_v9  ;;  %v1937_v41 = vpack.c.bf16 %v143_v16, %v139_v14  ;;  %v151_v43 = vand.u32 4294901760, %v58_v23  ;;  %v63_v61 = vld [vmem:[#allocation2 + $0x120] sm:$0xff] }
  0x26   :  { %2771 = vst [vmem:[#allocation30_spill] sm:$0xff] %v1923_v25  ;;  %2772 = vst [vmem:[#allocation31_spill] sm:$0xff] %v1925_v31  ;;  %v1941_v49 = vsub.f32 %v52_v0, %v139_v14  ;;  %v1943_v56 = vsub.f32 %v54_v1, %v143_v16  ;;  %v149_v57 = vand.u32 4294901760, %v55_v28  ;;  %v153_v58 = vand.u32 4294901760, %v57_v30 }
  0x27   :  { %2773 = vst [vmem:[#allocation32_spill] sm:$0xff] %v1927_v32  ;;  %2774 = vst [vmem:[#allocation33_spill] sm:$0xff] %v1929_v33  ;;  %v1945_v59 = vpack.c.bf16 %v145_v27, %v141_v26  ;;  %v1947_v8 = vsub.f32 %v51_v10, %v141_v26  ;;  %v155_v9 = vand.u32 4294901760, %v60_v36  ;;  %v1949_v40 = vsub.f32 %v53_v11, %v145_v27 }
  0x28   :  { %2775 = vst [vmem:[#allocation34_spill] sm:$0xff] %v1931_v35  ;;  %1401 = vmatpush1.bf16.msra.mxu1 %v1911_v13  ;;  %1593 = vmatpush1.bf16.msra.mxu0 %v1911_v13  ;;  %2776 = vst [vmem:[#allocation35_spill] sm:$0xff] %v1935_v39  ;;  %v159_v13 = vand.u32 4294901760, %v62_v38  ;;  %v1951_v37 = vsub.f32 %v56_v22, %v147_v42  ;;  %v157_v0 = vand.u32 4294901760, %v59_v44  ;;  %v161_v14 = vand.u32 4294901760, %v61_v48 }
  0x29   :  { %2777 = vst [vmem:[#allocation36_spill] sm:$0xff] %v1937_v41  ;;  %1403 = vmatprep.subr.bf16.mxu1 %v1919_v21  ;;  %1595 = vmatprep.subr.bf16.mxu0 %v1919_v21  ;;  %2778 = vst [vmem:[#allocation37_spill] sm:$0xff] %v1941_v49  ;;  %v1955_v1 = vpack.c.bf16 %v151_v43, %v147_v42  ;;  %v1957_v16 = vsub.f32 %v58_v23, %v151_v43  ;;  %v163_v10 = vand.u32 4294901760, %v64_v62  ;;  %v68_v21 = vld [vmem:[#allocation2 + $0x148] sm:$0xff] }
  0x2a   :  { %2779 = vst [vmem:[#allocation38_spill] sm:$0xff] %v1943_v56  ;;  %2780 = vst [vmem:[#allocation39_spill] sm:$0xff] %v1945_v59  ;;  %v167_v26 = vand.u32 4294901760, %v66_v63  ;;  %v1961_v11 = vpack.c.bf16 %v153_v58, %v149_v57  ;;  %v1963_v22 = vsub.f32 %v55_v28, %v149_v57  ;;  %v165_v27 = vand.u32 4294901760, %v63_v61  ;;  %v72_v28 = vld [vmem:[#allocation2 + $0x168] sm:$0xff]  ;;  %v74_v57 = vld [vmem:[#allocation2 + $0x178] sm:$0xff] }
  0x2b   :  { %2781 = vst [vmem:[#allocation40_spill] sm:$0xff] %v1947_v8  ;;  %2782 = vst [vmem:[#allocation41_spill] sm:$0xff] %v1949_v40  ;;  %v169_v29 = vand.u32 4294901760, %v65_v55  ;;  %v1965_v42 = vsub.f32 %v57_v30, %v153_v58  ;;  %v1967_v23 = vpack.c.bf16 %v159_v13, %v155_v9  ;;  %v1969_v43 = vsub.f32 %v60_v36, %v155_v9 }
  0x2c   :  { %2783 = vst [vmem:[#allocation42_spill] sm:$0xff] %v1951_v37  ;;  %1405 = vmatpush1.bf16.msra.mxu1 %v1929_v33  ;;  %1597 = vmatpush1.bf16.msra.mxu0 %v1929_v33  ;;  %2784 = vst [vmem:[#allocation43_spill] sm:$0xff] %v1955_v1  ;;  %v69_v33 = vld [vmem:[#allocation2 + $0x150] sm:$0xff]  ;;  %v1971_v19 = vsub.f32 %v62_v38, %v159_v13  ;;  %v1973_v15 = vpack.c.bf16 %v161_v14, %v157_v0  ;;  %v175_v37 = vand.u32 4294901760, %v70_v34  ;;  %v71_v13 = vld [vmem:[#allocation2 + $0x160] sm:$0xff] }
  0x2d   :  { %2785 = vst [vmem:[#allocation44_spill] sm:$0xff] %v1957_v16  ;;  %1407 = vmatprep.subr.bf16.mxu1 %v1937_v41  ;;  %1599 = vmatprep.subr.bf16.mxu0 %v1937_v41  ;;  %2786 = vst [vmem:[#allocation45_spill] sm:$0xff] %v1961_v11  ;;  %v1975_v16 = vsub.f32 %v59_v44, %v157_v0  ;;  %v171_v41 = vand.u32 4294901760, %v68_v21  ;;  %v1979_v30 = vsub.f32 %v61_v48, %v161_v14  ;;  %v73_v38 = vld [vmem:[#allocation2 + $0x170] sm:$0xff] }
  0x2e   :  { %2787 = vst [vmem:[#allocation46_spill] sm:$0xff] %v1963_v22  ;;  %2788 = vst [vmem:[#allocation47_spill] sm:$0xff] %v1965_v42  ;;  %v1981_v58 = vpack.c.bf16 %v167_v26, %v163_v10  ;;  %v173_v36 = vand.u32 4294901760, %v67_v20  ;;  %v177_v9 = vand.u32 4294901760, %v69_v33  ;;  %v1985_v44 = vsub.f32 %v64_v62, %v163_v10  ;;  %v75_v42 = vld [vmem:[#allocation2 + $0x180] sm:$0xff]  ;;  %v77_v22 = vld [vmem:[#allocation2 + $0x190] sm:$0xff] }
  0x2f   :  { %2789 = vst [vmem:[#allocation48_spill] sm:$0xff] %v1967_v23  ;;  %2790 = vst [vmem:[#allocation49_spill] sm:$0xff] %v1969_v43  ;;  %v1987_v0 = vsub.f32 %v66_v63, %v167_v26  ;;  %v1991_v48 = vsub.f32 %v63_v61, %v165_v27  ;;  %v1993_v14 = vsub.f32 %v65_v55, %v169_v29  ;;  %v183_v43 = vand.u32 4294901760, %v74_v57  ;;  %v80_v63 = vld [vmem:[#allocation2 + $0x1a8] sm:$0xff]  ;;  %v82_v26 = vld [vmem:[#allocation2 + $0x1b8] sm:$0xff] }
  0x30   :  { %2791 = vst [vmem:[#allocation50_spill] sm:$0xff] %v1971_v19  ;;  %2792 = vst [vmem:[#allocation51_spill] sm:$0xff] %v1973_v15  ;;  %1409 = vmatpush1.bf16.msra.mxu1 %v1945_v59  ;;  %1601 = vmatpush1.bf16.msra.mxu0 %v1945_v59  ;;  %v76_v19 = vld [vmem:[#allocation2 + $0x188] sm:$0xff]  ;;  %v78_v59 = vld [vmem:[#allocation2 + $0x198] sm:$0xff]  ;;  %v1995_v40 = vpack.c.bf16 %v175_v37, %v171_v41  ;;  %v1997_v8 = vsub.f32 %v68_v21, %v171_v41  ;;  %v181_v62 = vand.u32 4294901760, %v71_v13 }
  0x31   :  { %2793 = vst [vmem:[#allocation52_spill] sm:$0xff] %v1975_v16  ;;  %2794 = vst [vmem:[#allocation53_spill] sm:$0xff] %v1979_v30  ;;  %1411 = vmatprep.subr.bf16.mxu1 %v1955_v1  ;;  %1603 = vmatprep.subr.bf16.mxu0 %v1955_v1  ;;  %v1989_v16 = vpack.c.bf16 %v169_v29, %v165_v27  ;;  %v179_v30 = vand.u32 4294901760, %v72_v28  ;;  %v185_v10 = vand.u32 4294901760, %v73_v38  ;;  %v187_v55 = vand.u32 4294901760, %v76_v19 }
  0x32   :  { %2795 = vst [vmem:[#allocation54_spill] sm:$0xff] %v1981_v58  ;;  %2796 = vst [vmem:[#allocation55_spill] sm:$0xff] %v1985_v44  ;;  %v2001_v61 = vsub.f32 %v70_v34, %v175_v37  ;;  %v2003_v29 = vpack.c.bf16 %v177_v9, %v173_v36  ;;  %v191_v27 = vand.u32 4294901760, %v78_v59  ;;  %v2007_v21 = vsub.f32 %v67_v20, %v173_v36  ;;  %v86_v36 = vld [vmem:[#allocation2 + $0x1d8] sm:$0xff] }
  0x33   :  { %2797 = vst [vmem:[#allocation56_spill] sm:$0xff] %v1987_v0  ;;  %2798 = vst [vmem:[#allocation57_spill] sm:$0xff] %v1989_v16  ;;  %v2009_v41 = vsub.f32 %v69_v33, %v177_v9  ;;  %v189_v1 = vand.u32 4294901760, %v75_v42  ;;  %v195_v34 = vand.u32 4294901760, %v80_v63  ;;  %v199_v37 = vand.u32 4294901760, %v82_v26  ;;  %v26_v33 = vld [vmem:[%s2597_s1 + $0x8] sm:$0xff] }
  0x34   :  { %2799 = vst [vmem:[#allocation58_spill] sm:$0xff] %v1991_v48  ;;  %2800 = vst [vmem:[#allocation59_spill] sm:$0xff] %v1993_v14  ;;  %1413 = vmatpush1.bf16.msra.mxu1 %v1961_v11  ;;  %1605 = vmatpush1.bf16.msra.mxu0 %v1961_v11  ;;  %v2011_v14 = vpack.c.bf16 %v183_v43, %v179_v30  ;;  %v2013_v48 = vsub.f32 %v72_v28, %v179_v30  ;;  %v79_v11 = vld [vmem:[#allocation2 + $0x1a0] sm:$0xff] }
  0x35   :  { %2801 = vst [vmem:[#allocation60_spill] sm:$0xff] %v1995_v40  ;;  %2802 = vst [vmem:[#allocation61_spill] sm:$0xff] %v1997_v8  ;;  %1415 = vmatprep.subr.bf16.mxu1 %v1967_v23  ;;  %1607 = vmatprep.subr.bf16.mxu0 %v1967_v23  ;;  %v193_v8 = vand.u32 4294901760, %v77_v22  ;;  %v2015_v0 = vsub.f32 %v74_v57, %v183_v43  ;;  %v2017_v44 = vpack.c.bf16 %v185_v10, %v181_v62  ;;  %v84_v57 = vld [vmem:[#allocation2 + $0x1c8] sm:$0xff]  ;;  %v25_v9 = vld [vmem:[%s2597_s1] sm:$0xff] }
  0x36   :  { %2803 = vst [vmem:[#allocation62_spill] sm:$0xff] %v2001_v61  ;;  %2804 = vst [vmem:[#allocation63_spill] sm:$0xff] %v2003_v29  ;;  %v81_v61 = vld [vmem:[#allocation2 + $0x1b0] sm:$0xff]  ;;  %v2019_v56 = vsub.f32 %v71_v13, %v181_v62  ;;  %v2021_v20 = vsub.f32 %v73_v38, %v185_v10  ;;  %v2028_v28 = vpack.c.bf16 %v191_v27, %v187_v55  ;;  %v197_v62 = vand.u32 4294901760, %v79_v11 }
  0x37   :  { %2805 = vst [vmem:[#allocation64_spill] sm:$0xff] %v2007_v21  ;;  %2806 = vst [vmem:[#allocation65_spill] sm:$0xff] %v2009_v41  ;;  %v2030_v30 = vsub.f32 %v76_v19, %v187_v55  ;;  %v2032_v43 = vsub.f32 %v78_v59, %v191_v27  ;;  %v2039_v13 = vpack.c.bf16 %v193_v8, %v189_v1  ;;  %v201_v10 = vand.u32 4294901760, %v81_v61  ;;  %v83_v19 = vld [vmem:[#allocation2 + $0x1c0] sm:$0xff]  ;;  %v85_v55 = vld [vmem:[#allocation2 + $0x1d0] sm:$0xff] }
  0x38   :  { %2807 = vst [vmem:[#allocation66_spill] sm:$0xff] %v2011_v14  ;;  %2808 = vst [vmem:[#allocation67_spill] sm:$0xff] %v2013_v48  ;;  %1417 = vmatpush1.bf16.msra.mxu1 %v1973_v15  ;;  %1609 = vmatpush1.bf16.msra.mxu0 %v1973_v15  ;;  %v2041_v38 = vsub.f32 %v75_v42, %v189_v1  ;;  %v2043_v59 = vsub.f32 %v77_v22, %v193_v8  ;;  %v2049_v23 = vand.u32 4294901760, %v26_v33  ;;  %v88_v42 = vld [vmem:[#allocation2 + $0x1e8] sm:$0xff] }
  0x39   :  { %2809 = vst [vmem:[#allocation68_spill] sm:$0xff] %v2015_v0  ;;  %2810 = vst [vmem:[#allocation69_spill] sm:$0xff] %v2017_v44  ;;  %1419 = vmatprep.subr.bf16.mxu1 %v1981_v58  ;;  %1611 = vmatprep.subr.bf16.mxu0 %v1981_v58  ;;  %v2045_v27 = vpack.c.bf16 %v199_v37, %v195_v34  ;;  %v2047_v15 = vsub.f32 %v80_v63, %v195_v34  ;;  %v207_v58 = vand.u32 4294901760, %v86_v36 }
  0x3a   :  { %2811 = vst [vmem:[#allocation70_spill] sm:$0xff] %v2019_v56  ;;  %2812 = vst [vmem:[#allocation71_spill] sm:$0xff] %v2021_v20  ;;  %v2053_v20 = vand.u32 4294901760, %v25_v9  ;;  %v2057_v1 = vsub.f32 %v79_v11, %v197_v62  ;;  %v205_v8 = vand.u32 4294901760, %v83_v19  ;;  %v209_v22 = vand.u32 4294901760, %v85_v55 }
  0x3b   :  { %2813 = vst [vmem:[#allocation72_spill] sm:$0xff] %v2028_v28  ;;  %2814 = vst [vmem:[#allocation73_spill] sm:$0xff] %v2030_v30  ;;  %v203_v30 = vand.u32 4294901760, %v84_v57  ;;  %v2060_v63 = vsub.f32 %v26_v33, %v2049_v23  ;;  %v2066_v34 = vsub.f32 %v81_v61, %v201_v10  ;;  %v238_v11 = vand.u32 4294901760, %v1866_v45 }
  0x3c   :  { %2815 = vst [vmem:[#allocation74_spill] sm:$0xff] %v2032_v43  ;;  %2816 = vst [vmem:[#allocation75_spill] sm:$0xff] %v2039_v13  ;;  %v2051_v43 = vsub.f32 %v82_v26, %v199_v37  ;;  %1421 = vmatpush1.bf16.msra.mxu1 %v1989_v16  ;;  %1613 = vmatpush1.bf16.msra.mxu0 %v1989_v16  ;;  %v2064_v26 = vpack.c.bf16 %v201_v10, %v197_v62  ;;  %v244_v33 = vand.u32 4294901760, %v1870_v47 }
  0x3d   :  { %2817 = vst [vmem:[#allocation76_spill] sm:$0xff] %v2041_v38  ;;  %2818 = vst [vmem:[#allocation77_spill] sm:$0xff] %v2043_v59  ;;  %1423 = vmatprep.subr.bf16.mxu1 %v1995_v40  ;;  %1615 = vmatprep.subr.bf16.mxu0 %v1995_v40  ;;  %v2068_v37 = vsub.f32 %v84_v57, %v203_v30  ;;  %v221_v16 = vand.u32 4294901760, %v2060_v63  ;;  %v2075_v59 = vpack.c.bf16 %v207_v58, %v203_v30 }
  0x3e   :  { %2819 = vst [vmem:[#allocation78_spill] sm:$0xff] %v2045_v27  ;;  %2820 = vst [vmem:[#allocation79_spill] sm:$0xff] %v2047_v15  ;;  %v256_v15 = vand.u32 4294901760, %v1872_v50  ;;  %v2077_v40 = vsub.f32 %v86_v36, %v207_v58  ;;  %v211_v62 = vand.u32 4294901760, %v88_v42  ;;  %v2080_v61 = vsub.f32 %v25_v9, %v2053_v20 }
  0x3f   :  { %2821 = vst [vmem:[#allocation80_spill] sm:$0xff] %v2049_v23  ;;  %2822 = vst [vmem:[#allocation81_spill] sm:$0xff] %v2051_v43  ;;  %v90_v43 = vld [vmem:[#allocation2 + $0x1f8] sm:$0xff]  ;;  %v2084_v57 = vpack.c.bf16 %v209_v22, %v205_v8  ;;  %v222_v38 = vsub.f32 %v2060_v63, %v221_v16  ;;  %v262_v30 = vand.u32 4294901760, %v1874_v51  ;;  %v2090_v58 = vsub.f32 %v83_v19, %v205_v8 }
  0x40   :  { %2823 = vst [vmem:[#allocation82_spill] sm:$0xff] %v2053_v20  ;;  %2824 = vst [vmem:[#allocation83_spill] sm:$0xff] %v2057_v1  ;;  %v250_v1 = vand.u32 4294901760, %v1868_v46  ;;  %1425 = vmatpush1.bf16.msra.mxu1 %v2003_v29  ;;  %1617 = vmatpush1.bf16.msra.mxu0 %v2003_v29  ;;  %v215_v10 = vand.u32 4294901760, %v90_v43  ;;  %v2092_v36 = vsub.f32 %v85_v55, %v209_v22  ;;  %v274_v29 = vand.u32 4294901760, %v1876_v52 }
  0x41   :  { %2825 = vst [vmem:[#allocation84_spill] sm:$0xff] %v2060_v63  ;;  %2826 = vst [vmem:[#allocation85_spill] sm:$0xff] %v2064_v26  ;;  %1427 = vmatprep.subr.bf16.mxu1 %v2011_v14  ;;  %1619 = vmatprep.subr.bf16.mxu0 %v2011_v14  ;;  %v239_v9 = vsub.f32 %v1866_v45, %v238_v11  ;;  %v223_v20 = vand.u32 4294901760, %v222_v38  ;;  %v245_v63 = vsub.f32 %v1870_v47, %v244_v33 }
  0x42   :  { %2827 = vst [vmem:[#allocation86_spill] sm:$0xff] %v2066_v34  ;;  %2828 = vst [vmem:[#allocation87_spill] sm:$0xff] %v2068_v37  ;;  %v87_v37 = vld [vmem:[#allocation2 + $0x1e0] sm:$0xff]  ;;  %v89_v34 = vld [vmem:[#allocation2 + $0x1f0] sm:$0xff]  ;;  %963 = vmatprep.mubr.f32.mxu0 %v221_v16  ;;  %v257_v56 = vsub.f32 %v1872_v50, %v256_v15  ;;  %v2099_v0 = vsub.f32 %v88_v42, %v211_v62  ;;  %v263_v55 = vsub.f32 %v1874_v51, %v262_v30 }
  0x43   :  { %2829 = vst [vmem:[#allocation88_spill] sm:$0xff] %v2075_v59  ;;  %2830 = vst [vmem:[#allocation89_spill] sm:$0xff] %v2077_v40  ;;  %v251_v40 = vsub.f32 %v1868_v46, %v250_v1  ;;  %v213_v48 = vand.u32 4294901760, %v87_v37  ;;  %v217_v14 = vand.u32 4294901760, %v89_v34  ;;  %v275_v38 = vsub.f32 %v1876_v52, %v274_v29  ;;  %224 = vmatprep.mubr.f32.mxu1 %v223_v20 }
  0x44   :  { %2831 = vst [vmem:[#allocation90_spill] sm:$0xff] %v2080_v61  ;;  %2832 = vst [vmem:[#allocation91_spill] sm:$0xff] %v2084_v57  ;;  %1429 = vmatpush1.bf16.msra.mxu1 %v2017_v44  ;;  %1621 = vmatpush1.bf16.msra.mxu0 %v2017_v44  ;;  %v268_v16 = vand.u32 4294901760, %v1878_v53  ;;  %v280_v8 = vand.u32 4294901760, %v1880_v54  ;;  %v2110_v22 = vpack.c.bf16 %v215_v10, %v211_v62  ;;  %v240_v44 = vand.u32 4294901760, %v239_v9 }
  0x45   :  { %1431 = vmatprep.subr.bf16.mxu1 %v2028_v28  ;;  %1623 = vmatprep.subr.bf16.mxu0 %v2028_v28  ;;  %v2112_v42 = vsub.f32 %v90_v43, %v215_v10  ;;  %v2114_v19 = vsub.f32 %v87_v37, %v213_v48  ;;  %v252_v50 = vand.u32 4294901760, %v251_v40  ;;  %v246_v51 = vand.u32 4294901760, %v245_v63 }
  0x46   :  { %2833 = vst [vmem:[#allocation92_spill] sm:$0xff] %v2110_v22  ;;  %v258_v47 = vand.u32 4294901760, %v257_v56  ;;  %v2116_v52 = vpack.c.bf16 %v217_v14, %v213_v48  ;;  %v2836_v46 = vand.u32 4294901760, %v2080_v61  ;;  %v286_v28 = vand.u32 4294901760, %v1886_v60 }
  0x47   :  { %2834 = vst [vmem:[#allocation93_spill] sm:$0xff] %v2114_v19  ;;  %v298_v62 = vand.u32 4294901760, %v1893_v2  ;;  %v264_v20 = vand.u32 4294901760, %v263_v55  ;;  %v276_v43 = vand.u32 4294901760, %v275_v38  ;;  %v269_v40 = vsub.f32 %v1878_v53, %v268_v16 }
  0x48   :  { %2835 = vst [vmem:[#allocation94_spill] sm:$0xff] %v2116_v52  ;;  %v2121_v45 = vsub.f32 %v2080_v61, %v2836_v46  ;;  %1433 = vmatpush1.bf16.msra.mxu1 %v2039_v13  ;;  %1625 = vmatpush1.bf16.msra.mxu0 %v2039_v13  ;;  %v281_v56 = vsub.f32 %v1880_v54, %v280_v8  ;;  %v292_v37 = vand.u32 4294901760, %v1896_v3  ;;  %v304_v38 = vand.u32 4294901760, %v1899_v4 }
  0x49   :  { %1435 = vmatprep.subr.bf16.mxu1 %v2045_v27  ;;  %1627 = vmatprep.subr.bf16.mxu0 %v2045_v27  ;;  %v2131_v46 = vsub.f32 %v89_v34, %v217_v14  ;;  %v1638_v48 = vpack.c.bf16 %v250_v1, %v238_v11  ;;  %v2133_v63 = vpack.c.bf16 %v256_v15, %v244_v33  ;;  %v328_v1 = vand.u32 4294901760, %v1908_v12 }
  0x4a   :  { %v1446_v10 = vpack.c.bf16 %v252_v50, %v240_v44  ;;  %v2136_v9 = vpack.c.bf16 %v258_v47, %v246_v51  ;;  %v2138_v55 = vpack.c.bf16 %v274_v29, %v262_v30  ;;  %v229_v13 = vand.u32 4294901760, %v2121_v45 }
  0x4b   :  { %2837 = vst [vmem:[#allocation95_spill] sm:$0xff] %v2131_v46  ;;  %v2142_v19 = vpack.c.bf16 %v280_v8, %v268_v16  ;;  %v287_v27 = vsub.f32 %v1886_v60, %v286_v28  ;;  %v299_v14 = vsub.f32 %v1893_v2, %v298_v62  ;;  %v2148_v15 = vpack.c.bf16 %v276_v43, %v264_v20 }
  0x4c   :  { %1437 = vmatpush1.bf16.msra.mxu1 %v2064_v26  ;;  %1629 = vmatpush1.bf16.msra.mxu0 %v2064_v26  ;;  %v270_v47 = vand.u32 4294901760, %v269_v40  ;;  %v282_v50 = vand.u32 4294901760, %v281_v56  ;;  %v310_v51 = vand.u32 4294901760, %v1901_v5  ;;  %v293_v45 = vsub.f32 %v1896_v3, %v292_v37 }
  0x4d   :  { %1439 = vmatprep.subr.bf16.mxu1 %v2075_v59  ;;  %1631 = vmatprep.subr.bf16.mxu0 %v2075_v59  ;;  %v322_v44 = vand.u32 4294901760, %v1903_v6  ;;  %v316_v29 = vand.u32 4294901760, %v1905_v7  ;;  %v305_v34 = vsub.f32 %v1899_v4, %v304_v38  ;;  %v334_v11 = vand.u32 4294901760, %v1914_v17 }
  0x4e   :  { %v346_v33 = vand.u32 4294901760, %v1916_v18  ;;  %v340_v30 = vand.u32 4294901760, %v1921_v24  ;;  %v288_v16 = vand.u32 4294901760, %v287_v27  ;;  %v300_v8 = vand.u32 4294901760, %v299_v14 }
  0x4f   :  { %v2161_v20 = vpack.c.bf16 %v298_v62, %v286_v28  ;;  %v352_v43 = vand.u32 4294901760, %v1923_v25  ;;  %v1452_v40 = vpack.c.bf16 %v282_v50, %v270_v47  ;;  %v311_v56 = vsub.f32 %v1901_v5, %v310_v51 }
  0x50   :  { %1441 = vmatpush1.bf16.msra.mxu1 %v2084_v57  ;;  %1633 = vmatpush1.bf16.msra.mxu0 %v2084_v57  ;;  %v358_v59 = vand.u32 4294901760, %v1925_v31  ;;  %v370_v26 = vand.u32 4294901760, %v1927_v32  ;;  %v294_v27 = vand.u32 4294901760, %v293_v45  ;;  %v323_v28 = vsub.f32 %v1903_v6, %v322_v44 }
  0x51   :  { %1443 = vmatprep.subr.bf16.mxu1 %v2110_v22  ;;  %1635 = vmatprep.subr.bf16.mxu0 %v2110_v22  ;;  %v317_v62 = vsub.f32 %v1905_v7, %v316_v29  ;;  %v329_v14 = vsub.f32 %v1908_v12, %v328_v1  ;;  %v306_v46 = vand.u32 4294901760, %v305_v34  ;;  %v335_v47 = vsub.f32 %v1914_v17, %v334_v11 }
  0x52   :  { %v347_v50 = vsub.f32 %v1916_v18, %v346_v33  ;;  %v341_v57 = vsub.f32 %v1921_v24, %v340_v30  ;;  %v1454_v5 = vpack.c.bf16 %v300_v8, %v288_v16  ;;  %v2177_v4 = vpack.c.bf16 %v304_v38, %v292_v37 }
  0x53   :  { %v353_v3 = vsub.f32 %v1923_v25, %v352_v43  ;;  %v364_v45 = vand.u32 4294901760, %v1931_v35  ;;  %v312_v22 = vand.u32 4294901760, %v311_v56  ;;  %v2183_v12 = vpack.c.bf16 %v322_v44, %v310_v51 }
  0x54   :  { %1445 = vmatpush1.bf16.msra.mxu1 %v2116_v52  ;;  %1637 = vmatpush1.bf16.msra.mxu0 %v2116_v52  ;;  %v359_v34 = vsub.f32 %v1925_v31, %v358_v59  ;;  %v371_v18 = vsub.f32 %v1927_v32, %v370_v26  ;;  %v324_v16 = vand.u32 4294901760, %v323_v28  ;;  %v318_v37 = vand.u32 4294901760, %v317_v62  ;;  %v2894_v31 = vld [vmem:[#allocation47_spill] sm:$0xff] }
  0x55   :  { %1447 = vmatprep.subr.bf16.mxu1 %v1446_v10  ;;  %1639 = vmatprep.subr.bf16.mxu0 %v1638_v48  ;;  %v330_v38 = vand.u32 4294901760, %v329_v14  ;;  %v376_v8 = vand.u32 4294901760, %v1935_v39  ;;  %v1456_v25 = vpack.c.bf16 %v306_v46, %v294_v27  ;;  %v336_v24 = vand.u32 4294901760, %v335_v47  ;;  %v2839_v10 = vld [vmem:[#allocation38_spill] sm:$0xff]  ;;  %v2840_v14 = vld [vmem:[#allocation40_spill] sm:$0xff]  ;;  %v2910_v32 = vld [vmem:[#allocation71_spill] sm:$0xff] }
  0x56   :  { %v348_v17 = vand.u32 4294901760, %v347_v50  ;;  %v342_v7 = vand.u32 4294901760, %v341_v57  ;;  %v2838_v56 = vand.u32 4294901760, %v2080_v61  ;;  %v354_v51 = vand.u32 4294901760, %v353_v3 }
  0x57   :  { %230 = vmatmul.mubr.f32.vlgmr.msra.gmra.mrb[0].mxu1 %v229_v13  ;;  %v365_v44 = vsub.f32 %v1931_v35, %v364_v45  ;;  %v382_v52 = vand.u32 4294901760, %v1941_v49  ;;  %v394_v48 = vand.u32 4294901760, %v2839_v10  ;;  %v1652_v28 = vpack.c.bf16 %v328_v1, %v316_v29  ;;  %v2843_v1 = vld [vmem:[#allocation44_spill] sm:$0xff]  ;;  %v2852_v35 = vld [vmem:[#allocation58_spill] sm:$0xff] }
  0x58   :  { %967 = vmatmul.mubr.f32.vlgmr.msra.gmra.mrb[0].mxu0 %v2838_v56  ;;  %1449 = vmatpush1.bf16.msra.mxu1 %v2136_v9  ;;  %v2195_v46 = vpack.c.bf16 %v346_v33, %v334_v11  ;;  %v360_v27 = vand.u32 4294901760, %v359_v34  ;;  %v372_v57 = vand.u32 4294901760, %v371_v18  ;;  %v1458_v3 = vpack.c.bf16 %v324_v16, %v312_v22  ;;  %v2845_v34 = vld [vmem:[#allocation47_spill] sm:$0xff] }
  0x59   :  { %1641 = vmatpush1.bf16.msra.mxu0 %v2133_v63  ;;  %1451 = vmatprep.subr.bf16.mxu1 %v2148_v15  ;;  %v1460_v13 = vpack.c.bf16 %v330_v38, %v318_v37  ;;  %v377_v62 = vsub.f32 %v1935_v39, %v376_v8  ;;  %v388_v47 = vand.u32 4294901760, %v2840_v14  ;;  %v1462_v50 = vpack.c.bf16 %v348_v17, %v336_v24  ;;  %v2841_v63 = vld [vmem:[#allocation41_spill] sm:$0xff]  ;;  %v2847_v38 = vld [vmem:[#allocation50_spill] sm:$0xff] }
  0x5a   :  { %1643 = vmatprep.subr.bf16.mxu0 %v2138_v55  ;;  %v2201_v56 = vpack.c.bf16 %v352_v43, %v340_v30  ;;  %v2203_v9 = vpack.c.bf16 %v370_v26, %v358_v59  ;;  %v400_v29 = vand.u32 4294901760, %v2841_v63  ;;  %621 = vmatprep.mubr.f32.mxu1 %v2049_v23  ;;  %v2207_v18 = vpack.c.bf16 %v354_v51, %v342_v7  ;;  %v2842_v59 = vld [vmem:[#allocation42_spill] sm:$0xff] }
  0x5b   :  { %v366_v15 = vand.u32 4294901760, %v365_v44  ;;  %v383_v55 = vsub.f32 %v1941_v49, %v382_v52  ;;  %v395_v22 = vsub.f32 %v2839_v10, %v394_v48  ;;  %1230 = vmatprep.mubr.f32.mxu0 %v2049_v23  ;;  %v2213_v17 = vpack.c.bf16 %v372_v57, %v360_v27  ;;  %v2844_v30 = vld [vmem:[#allocation46_spill] sm:$0xff]  ;;  %v2851_v23 = vld [vmem:[#allocation56_spill] sm:$0xff] }
  0x5c   :  { %1453 = vmatpush1.bf16.msra.mxu1 %v1452_v40  ;;  %v2215_v24 = vpack.c.bf16 %v376_v8, %v364_v45  ;;  %v406_v26 = vand.u32 4294901760, %v2842_v59  ;;  %v418_v11 = vand.u32 4294901760, %v2843_v1  ;;  %v378_v7 = vand.u32 4294901760, %v377_v62  ;;  %v2846_v45 = vld [vmem:[#allocation49_spill] sm:$0xff] }
  0x5d   :  { %1645 = vmatpush1.bf16.msra.mxu0 %v2142_v19  ;;  %1455 = vmatprep.subr.bf16.mxu1 %v1454_v5  ;;  %v389_v33 = vsub.f32 %v2840_v14, %v388_v47  ;;  %v412_v43 = vand.u32 4294901760, %v2844_v30  ;;  %v424_v40 = vand.u32 4294901760, %v2845_v34  ;;  %v2223_v16 = vpack.c.bf16 %v394_v48, %v382_v52  ;;  %v2848_v5 = vld [vmem:[#allocation52_spill] sm:$0xff]  ;;  %v2850_v48 = vld [vmem:[#allocation55_spill] sm:$0xff] }
  0x5e   :  { %1647 = vmatprep.subr.bf16.mxu0 %v2161_v20  ;;  %v401_v19 = vsub.f32 %v2841_v63, %v400_v29  ;;  %v430_v37 = vand.u32 4294901760, %v2846_v45  ;;  %v442_v8 = vand.u32 4294901760, %v2847_v38  ;;  %v384_v51 = vand.u32 4294901760, %v383_v55  ;;  %v2849_v20 = vld [vmem:[#allocation53_spill] sm:$0xff] }
  0x5f   :  { %v396_v44 = vand.u32 4294901760, %v395_v22  ;;  %v436_v27 = vand.u32 4294901760, %v2848_v5  ;;  %v448_v57 = vand.u32 4294901760, %v2849_v20  ;;  %v407_v62 = vsub.f32 %v2842_v59, %v406_v26 }
  0x60   :  { %1457 = vmatpush1.bf16.msra.mxu1 %v1456_v25  ;;  %v419_v52 = vsub.f32 %v2843_v1, %v418_v11  ;;  %v454_v61 = vand.u32 4294901760, %v2850_v48  ;;  %v466_v63 = vand.u32 4294901760, %v2851_v23  ;;  %v1468_v55 = vpack.c.bf16 %v378_v7, %v366_v15 }
  0x61   :  { %1649 = vmatpush1.bf16.msra.mxu0 %v2177_v4  ;;  %1459 = vmatprep.subr.bf16.mxu1 %v1458_v3  ;;  %v390_v22 = vand.u32 4294901760, %v389_v33  ;;  %v413_v14 = vsub.f32 %v2844_v30, %v412_v43  ;;  %v425_v10 = vsub.f32 %v2845_v34, %v424_v40  ;;  %v402_v25 = vand.u32 4294901760, %v401_v19 }
  0x62   :  { %1651 = vmatprep.subr.bf16.mxu0 %v2183_v12  ;;  %v2238_v49 = vpack.c.bf16 %v400_v29, %v388_v47  ;;  %v431_v4 = vsub.f32 %v2846_v45, %v430_v37  ;;  %v443_v1 = vsub.f32 %v2847_v38, %v442_v8  ;;  %v1470_v59 = vpack.c.bf16 %v396_v44, %v384_v51  ;;  %v2853_v44 = vld [vmem:[#allocation59_spill] sm:$0xff] }
  0x63   :  { %v437_v39 = vsub.f32 %v2848_v5, %v436_v27  ;;  %v449_v3 = vsub.f32 %v2849_v20, %v448_v57  ;;  %v460_v12 = vand.u32 4294901760, %v2852_v35  ;;  %v408_v15 = vand.u32 4294901760, %v407_v62 }
  0x64   :  { %1461 = vmatpush1.bf16.msra.mxu1 %v1460_v13  ;;  %v420_v7 = vand.u32 4294901760, %v419_v52  ;;  %v455_v33 = vsub.f32 %v2850_v48, %v454_v61  ;;  %v467_v47 = vsub.f32 %v2851_v23, %v466_v63  ;;  %v1666_v29 = vpack.c.bf16 %v418_v11, %v406_v26  ;;  %v2854_v48 = vld [vmem:[#allocation61_spill] sm:$0xff]  ;;  %v2912_v23 = vld [vmem:[#allocation74_spill] sm:$0xff] }
  0x65   :  { %1653 = vmatpush1.bf16.msra.mxu0 %v1652_v28  ;;  %1463 = vmatprep.subr.bf16.mxu1 %v1462_v50  ;;  %v414_v19 = vand.u32 4294901760, %v413_v14  ;;  %v426_v51 = vand.u32 4294901760, %v425_v10  ;;  %v472_v5 = vand.u32 4294901760, %v2853_v44  ;;  %v1472_v38 = vpack.c.bf16 %v402_v25, %v390_v22  ;;  %v2855_v50 = vld [vmem:[#allocation62_spill] sm:$0xff] }
  0x66   :  { %1655 = vmatprep.subr.bf16.mxu0 %v2195_v46  ;;  %v2249_v20 = vpack.c.bf16 %v424_v40, %v412_v43  ;;  %v432_v45 = vand.u32 4294901760, %v431_v4  ;;  %v444_v13 = vand.u32 4294901760, %v443_v1  ;;  %v438_v28 = vand.u32 4294901760, %v437_v39 }
  0x67   :  { %v450_v62 = vand.u32 4294901760, %v449_v3  ;;  %v461_v52 = vsub.f32 %v2852_v35, %v460_v12  ;;  %v478_v34 = vand.u32 4294901760, %v2854_v48  ;;  %v1474_v46 = vpack.c.bf16 %v420_v7, %v408_v15  ;;  %v2859_v15 = vld [vmem:[#allocation71_spill] sm:$0xff] }
  0x68   :  { %1465 = vmatpush1.bf16.msra.mxu1 %v2207_v18  ;;  %v456_v14 = vand.u32 4294901760, %v455_v33  ;;  %v468_v10 = vand.u32 4294901760, %v467_v47  ;;  %v490_v26 = vand.u32 4294901760, %v2855_v50  ;;  %v1476_v1 = vpack.c.bf16 %v426_v51, %v414_v19  ;;  %v2860_v33 = vld [vmem:[#allocation73_spill] sm:$0xff]  ;;  %v2861_v19 = vld [vmem:[#allocation74_spill] sm:$0xff] }
  0x69   :  { %1657 = vmatpush1.bf16.msra.mxu0 %v2201_v56  ;;  %1467 = vmatprep.subr.bf16.mxu1 %v2213_v17  ;;  %v1670_v39 = vpack.c.bf16 %v442_v8, %v430_v37  ;;  %v473_v11 = vsub.f32 %v2853_v44, %v472_v5  ;;  %v484_v43 = vand.u32 4294901760, %v2007_v21  ;;  %v1478_v40 = vpack.c.bf16 %v444_v13, %v432_v45  ;;  %v2856_v37 = vld [vmem:[#allocation67_spill] sm:$0xff] }
  0x6a   :  { %1659 = vmatprep.subr.bf16.mxu0 %v2203_v9  ;;  %v2260_v22 = vpack.c.bf16 %v448_v57, %v436_v27  ;;  %v2262_v18 = vpack.c.bf16 %v466_v63, %v454_v61  ;;  %v496_v56 = vand.u32 4294901760, %v2009_v41  ;;  %v2265_v25 = vpack.c.bf16 %v450_v62, %v438_v28  ;;  %v2857_v61 = vld [vmem:[#allocation68_spill] sm:$0xff]  ;;  %v2858_v57 = vld [vmem:[#allocation70_spill] sm:$0xff]  ;;  %v2863_v62 = vld [vmem:[#allocation77_spill] sm:$0xff] }
  0x6b   :  { %v462_v4 = vand.u32 4294901760, %v461_v52  ;;  %v2267_v3 = vpack.c.bf16 %v472_v5, %v460_v12  ;;  %v479_v9 = vsub.f32 %v2854_v48, %v478_v34  ;;  %v2271_v17 = vpack.c.bf16 %v468_v10, %v456_v14  ;;  %v2862_v28 = vld [vmem:[#allocation76_spill] sm:$0xff]  ;;  %v2864_v52 = vld [vmem:[#allocation79_spill] sm:$0xff] }
  0x6c   :  { %1469 = vmatpush1.bf16.msra.mxu1 %v1468_v55  ;;  %v491_v45 = vsub.f32 %v2855_v50, %v490_v26  ;;  %v502_v8 = vand.u32 4294901760, %v2856_v37  ;;  %v514_v63 = vand.u32 4294901760, %v2857_v61  ;;  %v474_v27 = vand.u32 4294901760, %v473_v11  ;;  %v2865_v11 = vld [vmem:[#allocation81_spill] sm:$0xff] }
  0x6d   :  { %1661 = vmatpush1.bf16.msra.mxu0 %v2215_v24  ;;  %1471 = vmatprep.subr.bf16.mxu1 %v1470_v59  ;;  %v485_v5 = vsub.f32 %v2007_v21, %v484_v43  ;;  %v508_v12 = vand.u32 4294901760, %v2858_v57  ;;  %v520_v55 = vand.u32 4294901760, %v2859_v15  ;;  %v2280_v7 = vpack.c.bf16 %v490_v26, %v478_v34 }
  0x6e   :  { %1663 = vmatprep.subr.bf16.mxu0 %v2223_v16  ;;  %v497_v24 = vsub.f32 %v2009_v41, %v496_v56  ;;  %v526_v47 = vand.u32 4294901760, %v2860_v33  ;;  %v538_v51 = vand.u32 4294901760, %v2861_v19  ;;  %v480_v13 = vand.u32 4294901760, %v479_v9 }
  0x6f   :  { %v532_v59 = vand.u32 4294901760, %v2862_v28  ;;  %v544_v16 = vand.u32 4294901760, %v2863_v62  ;;  %v550_v14 = vand.u32 4294901760, %v2864_v52  ;;  %v492_v10 = vand.u32 4294901760, %v491_v45 }
  0x70   :  { %1473 = vmatpush1.bf16.msra.mxu1 %v1472_v38  ;;  %v503_v34 = vsub.f32 %v2856_v37, %v502_v8  ;;  %v515_v26 = vsub.f32 %v2857_v61, %v514_v63  ;;  %v562_v41 = vand.u32 4294901760, %v2865_v11  ;;  %v1484_v21 = vpack.c.bf16 %v474_v27, %v462_v4 }
  0x71   :  { %1665 = vmatpush1.bf16.msra.mxu0 %v2238_v49  ;;  %1475 = vmatprep.subr.bf16.mxu1 %v1474_v46  ;;  %v486_v9 = vand.u32 4294901760, %v485_v5  ;;  %v509_v50 = vsub.f32 %v2858_v57, %v508_v12  ;;  %v521_v48 = vsub.f32 %v2859_v15, %v520_v55  ;;  %v498_v44 = vand.u32 4294901760, %v497_v24 }
  0x72   :  { %1667 = vmatprep.subr.bf16.mxu0 %v1666_v29  ;;  %v2294_v35 = vpack.c.bf16 %v496_v56, %v484_v43  ;;  %v527_v49 = vsub.f32 %v2860_v33, %v526_v47  ;;  %v539_v38 = vsub.f32 %v2861_v19, %v538_v51  ;;  %v533_v45 = vsub.f32 %v2862_v28, %v532_v59  ;;  %v2866_v43 = vld [vmem:[#allocation83_spill] sm:$0xff]  ;;  %v2867_v28 = vld [vmem:[#allocation86_spill] sm:$0xff] }
  0x73   :  { %v545_v61 = vsub.f32 %v2863_v62, %v544_v16  ;;  %v551_v46 = vsub.f32 %v2864_v52, %v550_v14  ;;  %v563_v29 = vsub.f32 %v2865_v11, %v562_v41  ;;  %v1486_v4 = vpack.c.bf16 %v492_v10, %v480_v13 }
  0x74   :  { %1477 = vmatpush1.bf16.msra.mxu1 %v1476_v1  ;;  %v504_v27 = vand.u32 4294901760, %v503_v34  ;;  %v516_v5 = vand.u32 4294901760, %v515_v26  ;;  %v2740_v56 = vand.u32 4294901760, %v2866_v43  ;;  %v1682_v24 = vpack.c.bf16 %v514_v63, %v502_v8 }
  0x75   :  { %1669 = vmatpush1.bf16.msra.mxu0 %v2249_v20  ;;  %1479 = vmatprep.subr.bf16.mxu1 %v1478_v40  ;;  %v510_v19 = vand.u32 4294901760, %v509_v50  ;;  %v522_v33 = vand.u32 4294901760, %v521_v48  ;;  %v2739_v15 = vand.u32 4294901760, %v2867_v28  ;;  %v1488_v62 = vpack.c.bf16 %v498_v44, %v486_v9  ;;  %v2868_v44 = vld [vmem:[#allocation87_spill] sm:$0xff] }
  0x76   :  { %1671 = vmatprep.subr.bf16.mxu0 %v1670_v39  ;;  %v2305_v57 = vpack.c.bf16 %v520_v55, %v508_v12  ;;  %v528_v52 = vand.u32 4294901760, %v527_v49  ;;  %v540_v11 = vand.u32 4294901760, %v539_v38  ;;  %v534_v1 = vand.u32 4294901760, %v533_v45 }
  0x77   :  { %v546_v37 = vand.u32 4294901760, %v545_v61  ;;  %v552_v20 = vand.u32 4294901760, %v551_v46  ;;  %v564_v13 = vand.u32 4294901760, %v563_v29  ;;  %v1490_v40 = vpack.c.bf16 %v516_v5, %v504_v27  ;;  %v2876_v46 = vld [vmem:[#allocation20_spill] sm:$0xff]  ;;  %v2877_v29 = vld [vmem:[#allocation21_spill] sm:$0xff]  ;;  %v2878_v5 = vld [vmem:[#allocation22_spill] sm:$0xff] }
  0x78   :  { %1481 = vmatpush1.bf16.msra.mxu1 %v2265_v25  ;;  %v2309_v39 = vpack.c.bf16 %v538_v51, %v526_v47  ;;  %v2314_v48 = vsub.f32 %v2866_v43, %v2740_v56  ;;  %v2738_v50 = vand.u32 4294901760, %v2868_v44  ;;  %v1492_v8 = vpack.c.bf16 %v522_v33, %v510_v19  ;;  %v2870_v33 = vld [vmem:[#allocation12_spill] sm:$0xff]  ;;  %v2871_v19 = vld [vmem:[#allocation13_spill] sm:$0xff] }
  0x79   :  { %1673 = vmatpush1.bf16.msra.mxu0 %v2260_v22  ;;  %1483 = vmatprep.subr.bf16.mxu1 %v2271_v17  ;;  %v2322_v25 = vsub.f32 %v2867_v28, %v2739_v15  ;;  %v2869_v22 = vld [vmem:[#allocation89_spill] sm:$0xff]  ;;  %v2736_v63 = vand.u32 4294901760, %v2090_v58  ;;  %v1494_v12 = vpack.c.bf16 %v540_v11, %v528_v52  ;;  %v2326_v55 = vpack.c.bf16 %v544_v16, %v532_v59  ;;  %v2872_v59 = vld [vmem:[#allocation14_spill] sm:$0xff]  ;;  %v2873_v16 = vld [vmem:[#allocation15_spill] sm:$0xff] }
  0x7a   :  { %1675 = vmatprep.subr.bf16.mxu0 %v2262_v18  ;;  %v2737_v61 = vand.u32 4294901760, %v2869_v22  ;;  %v2328_v47 = vpack.c.bf16 %v562_v41, %v550_v14  ;;  %v2735_v51 = vand.u32 4294901760, %v2092_v36  ;;  %v1496_v17 = vpack.c.bf16 %v546_v37, %v534_v1  ;;  %v2874_v52 = vld [vmem:[#allocation16_spill] sm:$0xff]  ;;  %v2875_v14 = vld [vmem:[#allocation17_spill] sm:$0xff]  ;;  %v2900_v11 = vld [vmem:[#allocation58_spill] sm:$0xff] }
  0x7b   :  { %v2331_v10 = vpack.c.bf16 %v564_v13, %v552_v20  ;;  %v2734_v18 = vand.u32 4294901760, %v2099_v0  ;;  %v558_v26 = vand.u32 4294901760, %v2314_v48  ;;  %v2341_v41 = vsub.f32 %v2868_v44, %v2738_v50  ;;  %v2879_v20 = vld [vmem:[#allocation23_spill] sm:$0xff]  ;;  %v2880_v13 = vld [vmem:[#allocation24_spill] sm:$0xff]  ;;  %v2911_v37 = vld [vmem:[#allocation73_spill] sm:$0xff] }
  0x7c   :  { %1485 = vmatpush1.bf16.msra.mxu1 %v1484_v21  ;;  %v570_v21 = vand.u32 4294901760, %v2322_v25  ;;  %v2355_v9 = vsub.f32 %v2090_v58, %v2736_v63  ;;  %v2743_v49 = vand.u32 4294901760, %v2112_v42  ;;  %v593_v38 = vsub.f32 %v2092_v36, %v2735_v51  ;;  %v2906_v1 = vld [vmem:[#allocation95_spill] sm:$0xff]  ;;  %v2909_v63 = vld [vmem:[#allocation70_spill] sm:$0xff]  ;;  %v2914_v56 = vld [vmem:[#allocation77_spill] sm:$0xff] }
  0x7d   :  { %1677 = vmatpush1.bf16.msra.mxu0 %v2267_v3  ;;  %1487 = vmatprep.subr.bf16.mxu1 %v1486_v4  ;;  %v587_v3 = vsub.f32 %v2869_v22, %v2737_v61  ;;  %v2370_v27 = vsub.f32 %v2099_v0, %v2734_v18  ;;  %v576_v45 = vand.u32 4294901760, %v2341_v41  ;;  %v2893_v4 = vld [vmem:[#allocation44_spill] sm:$0xff]  ;;  %v2901_v41 = vld [vmem:[#allocation59_spill] sm:$0xff]  ;;  %v616_v51 = vand.u32 4294901760, %v2906_v1 }
  0x7e   :  { %1679 = vmatprep.subr.bf16.mxu0 %v2280_v7  ;;  %v611_v7 = vsub.f32 %v2112_v42, %v2743_v49  ;;  %v2913_v61 = vld [vmem:[#allocation76_spill] sm:$0xff]  ;;  %v2918_v18 = vand.u32 4294901760, %v2867_v28  ;;  %v582_v49 = vand.u32 4294901760, %v2355_v9  ;;  %v594_v34 = vand.u32 4294901760, %v593_v38 }
  0x7f   :  { %v588_v50 = vand.u32 4294901760, %v587_v3  ;;  %v1500_v3 = vpack.c.bf16 %v570_v21, %v558_v26  ;;  %v617_v15 = vsub.f32 %v2906_v1, %v616_v51  ;;  %v2919_v21 = vand.u32 4294901760, %v2868_v44 }
  0x80   :  { %1489 = vmatpush1.bf16.msra.mxu1 %v1488_v62  ;;  %v2887_v62 = vld [vmem:[#allocation93_spill] sm:$0xff]  ;;  %v1504_v9 = vpack.c.bf16 %v594_v34, %v582_v49  ;;  %v2921_v38 = vand.u32 4294901760, %v2090_v58  ;;  %v2925_v34 = vpack.c.bf16 %v2871_v19, %v2870_v33  ;;  %v2927_v49 = vld [vmem:[#allocation82_spill] sm:$0xff]  ;;  %v2932_v33 = vld [vmem:[#allocation84_spill] sm:$0xff] }
  0x81   :  { %1681 = vmatpush1.bf16.msra.mxu0 %v2294_v35  ;;  %1491 = vmatprep.subr.bf16.mxu1 %v1490_v40  ;;  %v604_v48 = vand.u32 4294901760, %v2887_v62  ;;  %v2907_v40 = vld [vmem:[#allocation67_spill] sm:$0xff]  ;;  %v1502_v26 = vpack.c.bf16 %v588_v50, %v576_v45  ;;  %v2924_v45 = vand.u32 4294901760, %v2112_v42  ;;  %v2933_v19 = vld [vmem:[#allocation80_spill] sm:$0xff] }
  0x82   :  { %1683 = vmatprep.subr.bf16.mxu0 %v1682_v24  ;;  %v2908_v24 = vld [vmem:[#allocation68_spill] sm:$0xff] }
  0x83   :  { %v605_v25 = vsub.f32 %v2887_v62, %v604_v48  ;;  %v618_v62 = vand.u32 4294901760, %v617_v15  ;;  %v2926_v15 = vld [vmem:[#allocation5_spill] sm:$0xff] }
  0x84   :  { %1493 = vmatpush1.bf16.msra.mxu1 %v1492_v8  ;;  %v2917_v8 = vand.u32 4294901760, %v2866_v43 }
  0x85   :  { %1685 = vmatpush1.bf16.msra.mxu0 %v2305_v57  ;;  %1495 = vmatprep.subr.bf16.mxu1 %v1494_v12  ;;  %v2916_v57 = vld [vmem:[#allocation81_spill] sm:$0xff] }
  0x86   :  { %1687 = vmatprep.subr.bf16.mxu0 %v2309_v39  ;;  %v1692_v35 = vpack.c.bf16 %v2918_v18, %v2917_v8  ;;  %v2920_v39 = vand.u32 4294901760, %v2869_v22  ;;  %v2922_v8 = vand.u32 4294901760, %v2092_v36 }
  0x88   :  { %1497 = vmatpush1.bf16.msra.mxu1 %v1496_v17  ;;  %v1694_v18 = vpack.c.bf16 %v2920_v39, %v2919_v21  ;;  %v600_v17 = vand.u32 4294901760, %v2370_v27  ;;  %v1696_v12 = vpack.c.bf16 %v2922_v8, %v2921_v38  ;;  %v1700_v27 = vpack.c.bf16 %v616_v51, %v604_v48  ;;  %v2931_v48 = vld [vmem:[#allocation7_spill] sm:$0xff]  ;;  %v2957_v38 = vld [vmem:[#allocation34_spill] sm:$0xff] }
  0x89   :  { %1689 = vmatpush1.bf16.msra.mxu0 %v2326_v55  ;;  %1499 = vmatprep.subr.bf16.mxu1 %v2331_v10  ;;  %v612_v55 = vand.u32 4294901760, %v611_v7  ;;  %v606_v10 = vand.u32 4294901760, %v605_v25  ;;  %v2928_v25 = vpack.c.bf16 %v2873_v16, %v2872_v59  ;;  %v2930_v51 = vpack.c.bf16 %v2875_v14, %v2874_v52  ;;  %v2937_v16 = vld [vmem:[#allocation9_spill] sm:$0xff]  ;;  %v2939_v14 = vld [vmem:[#allocation10_spill] sm:$0xff] }
  0x8a   :  { %1691 = vmatprep.subr.bf16.mxu0 %v2328_v47  ;;  %v2923_v47 = vand.u32 4294901760, %v2099_v0  ;;  %v2936_v59 = vpack.c.bf16 %v1893_v2, %v1886_v60  ;;  %v2938_v52 = vpack.c.bf16 %v2877_v29, %v2876_v46  ;;  %v2943_v60 = vld [vmem:[#allocation18_spill] sm:$0xff]  ;;  %v2944_v2 = vld [vmem:[#allocation27_spill] sm:$0xff] }
  0x8b   :  { %v1506_v50 = vpack.c.bf16 %v612_v55, %v600_v17  ;;  %v1508_v7 = vpack.c.bf16 %v618_v62, %v606_v10  ;;  %v2929_v62 = vld [vmem:[#allocation6_spill] sm:$0xff]  ;;  %v2947_v46 = vld [vmem:[#allocation19_spill] sm:$0xff]  ;;  %v2959_v10 = vld [vmem:[#allocation33_spill] sm:$0xff] }
  0x8c   :  { %1501 = vmatpush1.bf16.msra.mxu1 %v1500_v3  ;;  %v1698_v39 = vpack.c.bf16 %v2924_v45, %v2923_v47  ;;  %v2940_v3 = vpack.c.bf16 %v1903_v6, %v2878_v5  ;;  %v2948_v29 = vld [vmem:[#allocation30_spill] sm:$0xff]  ;;  %v2951_v6 = vld [vmem:[#allocation25_spill] sm:$0xff]  ;;  %v2952_v5 = vld [vmem:[#allocation32_spill] sm:$0xff] }
  0x8d   :  { %1693 = vmatpush1.bf16.msra.mxu0 %v1692_v35  ;;  %1503 = vmatprep.subr.bf16.mxu1 %v1502_v26  ;;  %v2934_v35 = vpack.c.bf16 %v1880_v54, %v1878_v53  ;;  %v2941_v53 = vld [vmem:[#allocation11_spill] sm:$0xff]  ;;  %v2942_v54 = vpack.c.bf16 %v2880_v13, %v2879_v20  ;;  %v2945_v26 = vld [vmem:[#allocation26_spill] sm:$0xff]  ;;  %v2955_v20 = vld [vmem:[#allocation28_spill] sm:$0xff] }
  0x8e   :  { %1695 = vmatprep.subr.bf16.mxu0 %v1694_v18  ;;  %v2946_v21 = vpack.c.bf16 %v2944_v2, %v2945_v26  ;;  %v2949_v18 = vld [vmem:[#allocation29_spill] sm:$0xff]  ;;  %v2953_v55 = vld [vmem:[#allocation31_spill] sm:$0xff]  ;;  %v2987_v2 = vld [vmem:[#allocation62_spill] sm:$0xff] }
  0x8f   :  { %v2950_v17 = vpack.c.bf16 %v2948_v29, %v2949_v18  ;;  %v2956_v13 = vld [vmem:[#allocation35_spill] sm:$0xff]  ;;  %v2961_v47 = vld [vmem:[#allocation37_spill] sm:$0xff]  ;;  %v2992_v18 = vld [vmem:[#allocation64_spill] sm:$0xff] }
  0x90   :  { %1505 = vmatpush1.bf16.msra.mxu1 %v1504_v9  ;;  %v2954_v9 = vpack.c.bf16 %v2952_v5, %v2953_v55  ;;  %v2958_v8 = vpack.c.bf16 %v2956_v13, %v2957_v38  ;;  %v2988_v26 = vld [vmem:[#allocation61_spill] sm:$0xff]  ;;  %v2995_v5 = vpack.c.bf16 %v2908_v24, %v2907_v40  ;;  %v3001_v13 = vpack.c.bf16 %v2914_v56, %v2913_v61  ;;  %v3002_v40 = vld [vmem:[#allocation75_spill] sm:$0xff]  ;;  %v3009_v56 = vld [vmem:[#allocation88_spill] sm:$0xff] }
  0x91   :  { %1697 = vmatpush1.bf16.msra.mxu0 %v1696_v12  ;;  %1507 = vmatprep.subr.bf16.mxu1 %v1506_v50  ;;  %v2935_v12 = vld [vmem:[#allocation8_spill] sm:$0xff]  ;;  %v2960_v50 = vld [vmem:[#allocation38_spill] sm:$0xff]  ;;  %v2991_v29 = vld [vmem:[#allocation65_spill] sm:$0xff]  ;;  %v3010_v61 = vpack.c.bf16 %v2092_v36, %v2090_v58 }
  0x92   :  { %1699 = vmatprep.subr.bf16.mxu0 %v1698_v39  ;;  %v2962_v45 = vpack.c.bf16 %v2960_v50, %v2961_v47  ;;  %v2963_v39 = vld [vmem:[#allocation36_spill] sm:$0xff]  ;;  %v2998_v55 = vld [vmem:[#allocation69_spill] sm:$0xff]  ;;  %v3003_v24 = vld [vmem:[#allocation79_spill] sm:$0xff] }
  0x93   :  { %v3004_v38 = vpack.c.bf16 %v2916_v57, %v3003_v24  ;;  %v3011_v57 = vld [vmem:[#allocation91_spill] sm:$0xff] }
  0x94   :  { %1509 = vmatpush1.bf16.msra.mxu1 %v1508_v7  ;;  %v2964_v7 = vld [vmem:[#allocation41_spill] sm:$0xff] }
  0x95   :  { %1701 = vmatpush1.bf16.msra.mxu0 %v1700_v27  ;;  %1511 = vmatprep.subr.bf16.mxu1 %v2925_v34  ;;  %v2965_v27 = vld [vmem:[#allocation40_spill] sm:$0xff] }
  0x96   :  { %1703 = vmatprep.subr.bf16.mxu0 %v2926_v15  ;;  %v2966_v34 = vpack.c.bf16 %v2964_v7, %v2965_v27  ;;  %v2967_v15 = vld [vmem:[#allocation39_spill] sm:$0xff] }
  0x97   :  { %623 = vmatmul.mubr.f32.vlgmr.msra.gmra.mrb[0].mxu1 %v2927_v49 }
  0x98   :  { %1232 = vmatmul.mubr.f32.vlgmr.msra.gmra.mrb[0].mxu0 %v2927_v49  ;;  %1513 = vmatpush1.bf16.msra.mxu1 %v2928_v25  ;;  %v2968_v25 = vld [vmem:[#allocation42_spill] sm:$0xff] }
  0x99   :  { %1705 = vmatpush1.bf16.msra.mxu0 %v2929_v62  ;;  %1515 = vmatprep.subr.bf16.mxu1 %v2930_v51  ;;  %v2969_v62 = vpack.c.bf16 %v2893_v4, %v2968_v25  ;;  %v2970_v51 = vld [vmem:[#allocation43_spill] sm:$0xff] }
  0x9a   :  { %1707 = vmatprep.subr.bf16.mxu0 %v2931_v48  ;;  %823 = vmatprep.mubr.f32.mxu1 %v2932_v33  ;;  %v2971_v48 = vpack.c.bf16 %v2894_v31, %v2844_v30  ;;  %v2972_v33 = vld [vmem:[#allocation45_spill] sm:$0xff]  ;;  %v2980_v4 = vld [vmem:[#allocation51_spill] sm:$0xff]  ;;  %v2984_v31 = vld [vmem:[#allocation54_spill] sm:$0xff]  ;;  %v2985_v30 = vpack.c.bf16 %v2901_v41, %v2900_v11  ;;  %v2997_v41 = vpack.c.bf16 %v2910_v32, %v2909_v63 }
  0x9b   :  { %1367 = vmatprep.mubr.f32.mxu0 %v2933_v19  ;;  %v2973_v19 = vld [vmem:[#allocation50_spill] sm:$0xff]  ;;  %v3006_v63 = vpack.c.bf16 %v2867_v28, %v2866_v43  ;;  %v3013_v28 = vld [vmem:[#allocation92_spill] sm:$0xff]  ;;  %v3014_v43 = vld [vmem:[#allocation93_spill] sm:$0xff] }
  0x9c   :  { %1517 = vmatpush1.bf16.msra.mxu1 %v2934_v35  ;;  %v2974_v35 = vld [vmem:[#allocation49_spill] sm:$0xff]  ;;  %v2996_v11 = vld [vmem:[#allocation66_spill] sm:$0xff] }
  0x9d   :  { %1709 = vmatpush1.bf16.msra.mxu0 %v2935_v12  ;;  %1519 = vmatprep.subr.bf16.mxu1 %v2936_v59  ;;  %v2975_v12 = vpack.c.bf16 %v2973_v19, %v2974_v35  ;;  %v2976_v59 = vld [vmem:[#allocation48_spill] sm:$0xff]  ;;  %v3005_v32 = vld [vmem:[#allocation78_spill] sm:$0xff] }
  0x9e   :  { %1711 = vmatprep.subr.bf16.mxu0 %v2937_v16  ;;  %v2977_v16 = vld [vmem:[#allocation53_spill] sm:$0xff] }
  0xa0   :  { %1521 = vmatpush1.bf16.msra.mxu1 %v2938_v52  ;;  %v2978_v52 = vld [vmem:[#allocation52_spill] sm:$0xff] }
  0xa1   :  { %1713 = vmatpush1.bf16.msra.mxu0 %v2939_v14  ;;  %1523 = vmatprep.subr.bf16.mxu1 %v2940_v3  ;;  %v2979_v14 = vpack.c.bf16 %v2977_v16, %v2978_v52  ;;  %v2981_v3 = vld [vmem:[#allocation56_spill] sm:$0xff] }
  0xa2   :  { %1715 = vmatprep.subr.bf16.mxu0 %v2941_v53  ;;  %v2982_v53 = vld [vmem:[#allocation55_spill] sm:$0xff] }
  0xa4   :  { %1525 = vmatpush1.bf16.msra.mxu1 %v2942_v54  ;;  %v2983_v54 = vpack.c.bf16 %v2981_v3, %v2982_v53 }
  0xa5   :  { %1717 = vmatpush1.bf16.msra.mxu0 %v2943_v60  ;;  %1527 = vmatprep.subr.bf16.mxu1 %v2946_v21  ;;  %v2986_v60 = vld [vmem:[#allocation57_spill] sm:$0xff]  ;;  %v2989_v21 = vpack.c.bf16 %v2987_v2, %v2988_v26 }
  0xa6   :  { %1719 = vmatprep.subr.bf16.mxu0 %v2947_v46  ;;  %v2990_v46 = vld [vmem:[#allocation60_spill] sm:$0xff] }
  0xa8   :  { %1529 = vmatpush1.bf16.msra.mxu1 %v2950_v17  ;;  %v2993_v17 = vpack.c.bf16 %v2991_v29, %v2992_v18 }
  0xa9   :  { %1721 = vmatpush1.bf16.msra.mxu0 %v2951_v6  ;;  %1531 = vmatprep.subr.bf16.mxu1 %v2954_v9  ;;  %v2994_v6 = vld [vmem:[#allocation63_spill] sm:$0xff]  ;;  %v2999_v9 = vpack.c.bf16 %v2912_v23, %v2911_v37  ;;  %v3007_v23 = vld [vmem:[#allocation85_spill] sm:$0xff]  ;;  %v3008_v37 = vpack.c.bf16 %v2869_v22, %v2868_v44  ;;  %v3016_v44 = vld [vmem:[#allocation94_spill] sm:$0xff] }
  0xaa   :  { %1723 = vmatprep.subr.bf16.mxu0 %v2955_v20  ;;  %v3000_v20 = vld [vmem:[#allocation72_spill] sm:$0xff]  ;;  %v3017_v22 = vld [vmem:[#allocation90_spill] sm:$0xff] }
  0xac   :  { %1533 = vmatpush1.bf16.msra.mxu1 %v2958_v8  ;;  %v3012_v8 = vpack.c.bf16 %v2112_v42, %v2099_v0 }
  0xad   :  { %1725 = vmatpush1.bf16.msra.mxu0 %v2959_v10  ;;  %1535 = vmatprep.subr.bf16.mxu1 %v2962_v45  ;;  %v3015_v10 = vpack.c.bf16 %v2906_v1, %v3014_v43 }
  0xae   :  { %1727 = vmatprep.subr.bf16.mxu0 %v2963_v39 }
  0xb0   :  { %1537 = vmatpush1.bf16.msra.mxu1 %v2966_v34 }
  0xb1   :  { %1729 = vmatpush1.bf16.msra.mxu0 %v2967_v15  ;;  %1539 = vmatprep.subr.bf16.mxu1 %v2969_v62 }
  0xb2   :  { %1731 = vmatprep.subr.bf16.mxu0 %v2970_v51 }
  0xb4   :  { %1541 = vmatpush1.bf16.msra.mxu1 %v2971_v48 }
  0xb5   :  { %1733 = vmatpush1.bf16.msra.mxu0 %v2972_v33  ;;  %1543 = vmatprep.subr.bf16.mxu1 %v2975_v12 }
  0xb6   :  { %1735 = vmatprep.subr.bf16.mxu0 %v2976_v59 }
  0xb8   :  { %1545 = vmatpush1.bf16.msra.mxu1 %v2979_v14 }
  0xb9   :  { %1737 = vmatpush1.bf16.msra.mxu0 %v2980_v4  ;;  %1547 = vmatprep.subr.bf16.mxu1 %v2983_v54 }
  0xba   :  { %1739 = vmatprep.subr.bf16.mxu0 %v2984_v31 }
  0xbc   :  { %1549 = vmatpush1.bf16.msra.mxu1 %v2985_v30 }
  0xbd   :  { %1741 = vmatpush1.bf16.msra.mxu0 %v2986_v60  ;;  %1551 = vmatprep.subr.bf16.mxu1 %v2989_v21 }
  0xbe   :  { %1743 = vmatprep.subr.bf16.mxu0 %v2990_v46 }
  0xc0   :  { %1553 = vmatpush1.bf16.msra.mxu1 %v2993_v17 }
  0xc1   :  { %1745 = vmatpush1.bf16.msra.mxu0 %v2994_v6  ;;  %1555 = vmatprep.subr.bf16.mxu1 %v2995_v5 }
  0xc2   :  { %1747 = vmatprep.subr.bf16.mxu0 %v2996_v11 }
  0xc4   :  { %1557 = vmatpush1.bf16.msra.mxu1 %v2997_v41 }
  0xc5   :  { %1749 = vmatpush1.bf16.msra.mxu0 %v2998_v55  ;;  %1559 = vmatprep.subr.bf16.mxu1 %v2999_v9 }
  0xc6   :  { %1751 = vmatprep.subr.bf16.mxu0 %v3000_v20 }
  0xc8   :  { %1561 = vmatpush1.bf16.msra.mxu1 %v3001_v13 }
  0xc9   :  { %1753 = vmatpush1.bf16.msra.mxu0 %v3002_v40  ;;  %1563 = vmatprep.subr.bf16.mxu1 %v3004_v38 }
  0xca   :  { %1755 = vmatprep.subr.bf16.mxu0 %v3005_v32 }
  0xcc   :  { %1565 = vmatpush1.bf16.msra.mxu1 %v3006_v63 }
  0xcd   :  { %1757 = vmatpush1.bf16.msra.mxu0 %v3007_v23  ;;  %1567 = vmatprep.subr.bf16.mxu1 %v3008_v37 }
  0xce   :  { %1759 = vmatprep.subr.bf16.mxu0 %v3009_v56 }
  0xd0   :  { %1569 = vmatpush1.bf16.msra.mxu1 %v3010_v61 }
  0xd1   :  { %1761 = vmatpush1.bf16.msra.mxu0 %v3011_v57  ;;  %1571 = vmatprep.subr.bf16.mxu1 %v3012_v8 }
  0xd2   :  { %1763 = vmatprep.subr.bf16.mxu0 %v3013_v28 }
  0xd4   :  { %1573 = vmatpush1.bf16.msra.mxu1 %v3015_v10 }
  0xd5   :  { %1765 = vmatpush1.bf16.msra.mxu0 %v3016_v44 }
  0xd7   :  { %826 = vmatmul.mubr.f32.vlgmr.msra.gmra.mrb[0].mxu1 %v3017_v22 }
  0xd8   :  { %1369 = vmatmul.mubr.f32.vlgmr.msra.gmra.mrb[0].mxu0 %v2927_v49 }
 0x1aa   :  { %v827_v58 = vpop.f32.mrb[0].mxu1 }
 0x1ab   :  { %v1370_v36 = vpop.f32.mrb[0].mxu0  ;;  %v829_v47 = vpop.f32.mrb[1].mxu1 }
 0x1ac   :  { %v1766_v50 = vadd.f32 %v1370_v36, %v827_v58  ;;  %v1372_v45 = vpop.f32.mrb[1].mxu0 }
 0x1ad   :  { %v1767_v39 = vadd.f32 %v1372_v45, %v829_v47 }
 0x1ae   :  { %1375 = vst [vmem:[%s2598_s2] sm:$0xff] %v1766_v50 }
 0x1af   :  { %1376 = vst [vmem:[%s2598_s2 + $0x8] sm:$0xff] %v1767_v39 }
 0x1b0   :  { %1381 = vsyncpa [#allocation3], 1 }

</bundles_post_ra>
